<compile_context>
chip_gen: v6e
topology: v6e:2x2x1
jax: 0.10.0
libtpu: 0.0.40
codegen_flags: <defaults>
</compile_context>

<pallas_src>
import functools

import jax
import jax.numpy as jnp
from jax.experimental import pallas as pl
from jax.experimental.pallas import tpu as pltpu


# Column offsets of each parameter group inside the packed (8, 128) slab.
_W1_COL, _W2_COL, _W3_COL = 0, 8, 16
_BIAS_ROW = 4


def _mlp_kernel(x_ref, p_ref, o_ref):
    x = x_ref[...].astype(jnp.float32)   # (bm, 4)
    p = p_ref[...]                       # (8, 128) packed parameter slab

    def layer(h, col, n_out):
        w = p[0:4, col:col + n_out]                        # (4, n_out) = (in, out)
        b = p[_BIAS_ROW:_BIAS_ROW + 1, col:col + n_out]    # (1, n_out)
        # K=4 unrolled VPU broadcast-FMA; no MXU push/drain round-trips.
        acc = h[:, 0:1] * w[0:1, :] + b
        for k in range(1, 4):
            acc = acc + h[:, k:k + 1] * w[k:k + 1, :]
        return jnp.maximum(acc, 0.0)

    h1 = layer(x, _W1_COL, 4)
    h2 = layer(h1, _W2_COL, 4)
    h3 = layer(h2, _W3_COL, 1)
    o_ref[...] = h3.astype(o_ref.dtype)


def pack_params(params):
    """One-time prep (outside the hot path): transpose weights to (in, out),
    fold biases, and pad everything into one (8, 128) f32 slab."""
    slab = jnp.zeros((8, 128), jnp.float32)
    slab = slab.at[0:4, _W1_COL:_W1_COL + 4].set(params["w1"].T.astype(jnp.float32))
    slab = slab.at[_BIAS_ROW, _W1_COL:_W1_COL + 4].set(params["b1"].astype(jnp.float32))
    slab = slab.at[0:4, _W2_COL:_W2_COL + 4].set(params["w2"].T.astype(jnp.float32))
    slab = slab.at[_BIAS_ROW, _W2_COL:_W2_COL + 4].set(params["b2"].astype(jnp.float32))
    slab = slab.at[0:4, _W3_COL:_W3_COL + 1].set(params["w3"].T.astype(jnp.float32))
    slab = slab.at[_BIAS_ROW, _W3_COL].set(params["b3"].astype(jnp.float32)[0])
    return slab


def _pick_batch_block(B):
    # Largest batch block (multiple of 8) that divides B; fall back to the
    # full (possibly odd/tiny) batch as a single full-array block.
    for bm in (2048, 1024, 512, 256, 128, 64, 32, 16, 8):
        if B % bm == 0:
            return bm
    return B


@jax.jit
def red_forward(x, param_slab):
    """x: (B, 4) activations. param_slab: (8, 128) from pack_params()."""
    B = x.shape[0]
    bm = _pick_batch_block(B)
    grid = (B // bm,)
    return pl.pallas_call(
        _mlp_kernel,
        out_shape=jax.ShapeDtypeStruct((B, 1), x.dtype),
        grid=grid,
        in_specs=[
            pl.BlockSpec((bm, 4), lambda i: (i, 0)),      # batch tile of x
            pl.BlockSpec((8, 128), lambda i: (0, 0)),     # shared param slab
        ],
        out_specs=pl.BlockSpec((bm, 1), lambda i: (i, 0)),
        compiler_params=pltpu.CompilerParams(
            dimension_semantics=("parallel",)),
    )(x, param_slab)


def init_params(key):
    """Deterministic init matching the shapes of Red.__init__ (PyTorch (out,in))."""
    k1, k2, k3, k4, k5, k6 = jax.random.split(key, 6)

    def unif(k, shape, fan_in):
        bound = 1.0 / jnp.sqrt(fan_in)
        return jax.random.uniform(k, shape, jnp.float32, -bound, bound)

    return {
        "w1": unif(k1, (4, 4), 4.0),
        "b1": unif(k2, (4,), 4.0),
        "w2": unif(k3, (4, 4), 4.0),
        "b2": unif(k4, (4,), 4.0),
        "w3": unif(k5, (1, 4), 4.0),
        "b3": unif(k6, (1,), 4.0),
    }


def red_forward_ref(x, params):
    """Plain-JAX reference mirroring the PyTorch forward exactly."""
    h1 = jax.nn.relu(x @ params["w1"].T + params["b1"])
    h2 = jax.nn.relu(h1 @ params["w2"].T + params["b2"])
    return jax.nn.relu(h2 @ params["w3"].T + params["b3"])


if __name__ == "__main__":
    key = jax.random.PRNGKey(0)
    pkey, xkey = jax.random.split(key)
    params = init_params(pkey)

    # One-time parameter prep (transposes + packing hoisted out of hot path).
    slab = pack_params(params)

    # Small deterministic input: batch=8, in_features=4 (Linear(4, 4)).
    x = jax.random.normal(xkey, (8, 4), dtype=jnp.float32)

    out = jax.block_until_ready(red_forward(x, slab))

    ref = red_forward_ref(x, params)
    assert out.shape == (8, 1), out.shape
    assert jnp.allclose(out, ref, atol=1e-5, rtol=1e-5), (out, ref)

    print("KERNEL_OK")
</pallas_src>

<mosaic_0001>
module attributes {stable_mosaic.version = 11 : i64} {
  func.func @_mlp_kernel(%arg0: i32, %arg1: memref<8x4xf32, #tpu.memory_space<vmem>>, %arg2: memref<8x128xf32, #tpu.memory_space<vmem>>, %arg3: memref<8x1xf32, #tpu.memory_space<vmem>>) attributes {dimension_semantics = [#tpu.dimension_semantics<parallel>], iteration_bounds = array<i64: 1>, scalar_prefetch = 0 : i64, scratch_operands = 0 : i64, tpu.core_type = #tpu.core_type<tc>, window_params = [{transform_indices = @transform_0, window_bounds = array<i64: 8, 4>}, {pipeline_mode = #tpu.pipeline_mode<synchronous>, transform_indices = @transform_1, window_bounds = array<i64: 8, 128>}, {transform_indices = @transform_2, window_bounds = array<i64: 8, 1>}]} {
    %c0 = arith.constant 0 : index
    %c0_0 = arith.constant 0 : index
    %0 = vector.load %arg1[%c0, %c0_0] : memref<8x4xf32, #tpu.memory_space<vmem>>, vector<8x4xf32>
    %c0_1 = arith.constant 0 : index
    %c0_2 = arith.constant 0 : index
    %1 = vector.load %arg2[%c0_1, %c0_2] : memref<8x128xf32, #tpu.memory_space<vmem>>, vector<8x128xf32>
    %2 = vector.extract_strided_slice %1 {offsets = [0, 0], sizes = [4, 4], strides = [1, 1]} : vector<8x128xf32> to vector<4x4xf32>
    %3 = vector.extract_strided_slice %1 {offsets = [4, 0], sizes = [1, 4], strides = [1, 1]} : vector<8x128xf32> to vector<1x4xf32>
    %4 = vector.extract_strided_slice %0 {offsets = [0, 0], sizes = [8, 1], strides = [1, 1]} : vector<8x4xf32> to vector<8x1xf32>
    %5 = vector.extract_strided_slice %2 {offsets = [0, 0], sizes = [1, 4], strides = [1, 1]} : vector<4x4xf32> to vector<1x4xf32>
    %6 = vector.broadcast %4 : vector<8x1xf32> to vector<8x4xf32>
    %7 = vector.broadcast %5 : vector<1x4xf32> to vector<8x4xf32>
    %8 = arith.mulf %6, %7 : vector<8x4xf32>
    %9 = vector.broadcast %3 : vector<1x4xf32> to vector<8x4xf32>
    %10 = arith.addf %8, %9 : vector<8x4xf32>
    %11 = vector.extract_strided_slice %0 {offsets = [0, 1], sizes = [8, 1], strides = [1, 1]} : vector<8x4xf32> to vector<8x1xf32>
    %12 = vector.extract_strided_slice %2 {offsets = [1, 0], sizes = [1, 4], strides = [1, 1]} : vector<4x4xf32> to vector<1x4xf32>
    %13 = vector.broadcast %11 : vector<8x1xf32> to vector<8x4xf32>
    %14 = vector.broadcast %12 : vector<1x4xf32> to vector<8x4xf32>
    %15 = arith.mulf %13, %14 : vector<8x4xf32>
    %16 = arith.addf %10, %15 : vector<8x4xf32>
    %17 = vector.extract_strided_slice %0 {offsets = [0, 2], sizes = [8, 1], strides = [1, 1]} : vector<8x4xf32> to vector<8x1xf32>
    %18 = vector.extract_strided_slice %2 {offsets = [2, 0], sizes = [1, 4], strides = [1, 1]} : vector<4x4xf32> to vector<1x4xf32>
    %19 = vector.broadcast %17 : vector<8x1xf32> to vector<8x4xf32>
    %20 = vector.broadcast %18 : vector<1x4xf32> to vector<8x4xf32>
    %21 = arith.mulf %19, %20 : vector<8x4xf32>
    %22 = arith.addf %16, %21 : vector<8x4xf32>
    %23 = vector.extract_strided_slice %0 {offsets = [0, 3], sizes = [8, 1], strides = [1, 1]} : vector<8x4xf32> to vector<8x1xf32>
    %24 = vector.extract_strided_slice %2 {offsets = [3, 0], sizes = [1, 4], strides = [1, 1]} : vector<4x4xf32> to vector<1x4xf32>
    %25 = vector.broadcast %23 : vector<8x1xf32> to vector<8x4xf32>
    %26 = vector.broadcast %24 : vector<1x4xf32> to vector<8x4xf32>
    %27 = arith.mulf %25, %26 : vector<8x4xf32>
    %28 = arith.addf %22, %27 : vector<8x4xf32>
    %cst = arith.constant 0.000000e+00 : f32
    %29 = vector.broadcast %cst : f32 to vector<8x4xf32>
    %30 = arith.maximumf %28, %29 : vector<8x4xf32>
    %31 = vector.extract_strided_slice %1 {offsets = [0, 8], sizes = [4, 4], strides = [1, 1]} : vector<8x128xf32> to vector<4x4xf32>
    %32 = vector.extract_strided_slice %1 {offsets = [4, 8], sizes = [1, 4], strides = [1, 1]} : vector<8x128xf32> to vector<1x4xf32>
    %33 = vector.extract_strided_slice %30 {offsets = [0, 0], sizes = [8, 1], strides = [1, 1]} : vector<8x4xf32> to vector<8x1xf32>
    %34 = vector.extract_strided_slice %31 {offsets = [0, 0], sizes = [1, 4], strides = [1, 1]} : vector<4x4xf32> to vector<1x4xf32>
    %35 = vector.broadcast %33 : vector<8x1xf32> to vector<8x4xf32>
    %36 = vector.broadcast %34 : vector<1x4xf32> to vector<8x4xf32>
    %37 = arith.mulf %35, %36 : vector<8x4xf32>
    %38 = vector.broadcast %32 : vector<1x4xf32> to vector<8x4xf32>
    %39 = arith.addf %37, %38 : vector<8x4xf32>
    %40 = vector.extract_strided_slice %30 {offsets = [0, 1], sizes = [8, 1], strides = [1, 1]} : vector<8x4xf32> to vector<8x1xf32>
    %41 = vector.extract_strided_slice %31 {offsets = [1, 0], sizes = [1, 4], strides = [1, 1]} : vector<4x4xf32> to vector<1x4xf32>
    %42 = vector.broadcast %40 : vector<8x1xf32> to vector<8x4xf32>
    %43 = vector.broadcast %41 : vector<1x4xf32> to vector<8x4xf32>
    %44 = arith.mulf %42, %43 : vector<8x4xf32>
    %45 = arith.addf %39, %44 : vector<8x4xf32>
    %46 = vector.extract_strided_slice %30 {offsets = [0, 2], sizes = [8, 1], strides = [1, 1]} : vector<8x4xf32> to vector<8x1xf32>
    %47 = vector.extract_strided_slice %31 {offsets = [2, 0], sizes = [1, 4], strides = [1, 1]} : vector<4x4xf32> to vector<1x4xf32>
    %48 = vector.broadcast %46 : vector<8x1xf32> to vector<8x4xf32>
    %49 = vector.broadcast %47 : vector<1x4xf32> to vector<8x4xf32>
    %50 = arith.mulf %48, %49 : vector<8x4xf32>
    %51 = arith.addf %45, %50 : vector<8x4xf32>
    %52 = vector.extract_strided_slice %30 {offsets = [0, 3], sizes = [8, 1], strides = [1, 1]} : vector<8x4xf32> to vector<8x1xf32>
    %53 = vector.extract_strided_slice %31 {offsets = [3, 0], sizes = [1, 4], strides = [1, 1]} : vector<4x4xf32> to vector<1x4xf32>
    %54 = vector.broadcast %52 : vector<8x1xf32> to vector<8x4xf32>
    %55 = vector.broadcast %53 : vector<1x4xf32> to vector<8x4xf32>
    %56 = arith.mulf %54, %55 : vector<8x4xf32>
    %57 = arith.addf %51, %56 : vector<8x4xf32>
    %cst_3 = arith.constant 0.000000e+00 : f32
    %58 = vector.broadcast %cst_3 : f32 to vector<8x4xf32>
    %59 = arith.maximumf %57, %58 : vector<8x4xf32>
    %60 = vector.extract_strided_slice %1 {offsets = [0, 16], sizes = [4, 1], strides = [1, 1]} : vector<8x128xf32> to vector<4x1xf32>
    %61 = vector.extract_strided_slice %1 {offsets = [4, 16], sizes = [1, 1], strides = [1, 1]} : vector<8x128xf32> to vector<1x1xf32>
    %62 = vector.extract_strided_slice %59 {offsets = [0, 0], sizes = [8, 1], strides = [1, 1]} : vector<8x4xf32> to vector<8x1xf32>
    %63 = vector.extract_strided_slice %60 {offsets = [0, 0], sizes = [1, 1], strides = [1, 1]} : vector<4x1xf32> to vector<1x1xf32>
    %64 = vector.broadcast %63 : vector<1x1xf32> to vector<8x1xf32>
    %65 = arith.mulf %62, %64 : vector<8x1xf32>
    %66 = vector.broadcast %61 : vector<1x1xf32> to vector<8x1xf32>
    %67 = arith.addf %65, %66 : vector<8x1xf32>
    %68 = vector.extract_strided_slice %59 {offsets = [0, 1], sizes = [8, 1], strides = [1, 1]} : vector<8x4xf32> to vector<8x1xf32>
    %69 = vector.extract_strided_slice %60 {offsets = [1, 0], sizes = [1, 1], strides = [1, 1]} : vector<4x1xf32> to vector<1x1xf32>
    %70 = vector.broadcast %69 : vector<1x1xf32> to vector<8x1xf32>
    %71 = arith.mulf %68, %70 : vector<8x1xf32>
    %72 = arith.addf %67, %71 : vector<8x1xf32>
    %73 = vector.extract_strided_slice %59 {offsets = [0, 2], sizes = [8, 1], strides = [1, 1]} : vector<8x4xf32> to vector<8x1xf32>
    %74 = vector.extract_strided_slice %60 {offsets = [2, 0], sizes = [1, 1], strides = [1, 1]} : vector<4x1xf32> to vector<1x1xf32>
    %75 = vector.broadcast %74 : vector<1x1xf32> to vector<8x1xf32>
    %76 = arith.mulf %73, %75 : vector<8x1xf32>
    %77 = arith.addf %72, %76 : vector<8x1xf32>
    %78 = vector.extract_strided_slice %59 {offsets = [0, 3], sizes = [8, 1], strides = [1, 1]} : vector<8x4xf32> to vector<8x1xf32>
    %79 = vector.extract_strided_slice %60 {offsets = [3, 0], sizes = [1, 1], strides = [1, 1]} : vector<4x1xf32> to vector<1x1xf32>
    %80 = vector.broadcast %79 : vector<1x1xf32> to vector<8x1xf32>
    %81 = arith.mulf %78, %80 : vector<8x1xf32>
    %82 = arith.addf %77, %81 : vector<8x1xf32>
    %cst_4 = arith.constant 0.000000e+00 : f32
    %83 = vector.broadcast %cst_4 : f32 to vector<8x1xf32>
    %84 = arith.maximumf %82, %83 : vector<8x1xf32>
    %c0_5 = arith.constant 0 : index
    %c0_6 = arith.constant 0 : index
    %85 = vector.load %arg3[%c0_5, %c0_6] : memref<8x1xf32, #tpu.memory_space<vmem>>, vector<8x1xf32>
    tpu.vector_store %arg3[%c0_5, %c0_6], %84 {strides = array<i32>} : memref<8x1xf32, #tpu.memory_space<vmem>>, vector<8x1xf32>,
    return
  }
  func.func @transform_0(%arg0: i32) -> (i32, i32) {
    %c0_i32 = arith.constant 0 : i32
    %c0_i32_0 = arith.constant 0 : i32
    return %arg0, %c0_i32 : i32, i32
  }
  func.func @transform_1(%arg0: i32) -> (i32, i32) {
    %c0_i32 = arith.constant 0 : i32
    %c0_i32_0 = arith.constant 0 : i32
    %c0_i32_1 = arith.constant 0 : i32
    return %c0_i32, %c0_i32_0 : i32, i32
  }
  func.func @transform_2(%arg0: i32) -> (i32, i32) {
    %c0_i32 = arith.constant 0 : i32
    %c0_i32_0 = arith.constant 0 : i32
    return %arg0, %c0_i32 : i32, i32
  }
}

</mosaic_0001>

<bundles_post_ra>
// kernel: red_forward.1
= control target key start
LH: loop header
LB: loop body
LE: loop exit
PB: predicated region body
PF: predicated region fallthrough
CT: control target
= control target key end

     0   :  { %v154_v0 = vmov 0   ;;  %v155_v2 = vmov 2   ;;  %v156_v3 = vmov 1   ;;  %v157_v4 = vmov 3   ;;  %s160_s13 = smov 122   ;;  %s161_s14 = smov 120   ;;  %s192_s0 = inlined_call_operand.vmem [shape: f32[8,4], index: 0, kind: input, shape index: {}]   ;;  %s193_s1 = inlined_call_operand.vmem [shape: f32[8,128], index: 1, kind: input, shape index: {}]   ;;  %s194_s2 = inlined_call_operand.vmem [shape: f32[8,1], index: 2, kind: output, shape index: {}]  }
   0x1   :  { %147 = vset.pattern.permute.xlu0 %v154_v0  ;;  %v11_v1 = vld [vmem:[%s192_s0] sm:$0xff]  ;;  %149 = vset.pattern.permute.xlu1 %v155_v2  ;;  %v18_v5 = vlaneseq  ;;  %s158_s0 = smov 121   ;;  %s162_s15 = smov 127   ;;  %vm130_vm0 = vcmask 7168  }
   0x2   :  { %15 = vperm.xlu0 %147, %v11_v1   ;;  %39 = vperm.xlu1 %149, %v11_v1   ;;  %v12_v8 = vld [vmem:[%s193_s1] sm:$0xff]  ;;  %s159_s1 = smov 123   ;;  %s163_s16 = smov 126  }
   0x3   :  { %v19_v6 = vshrl.u32 %v18_v5, 7  ;;  %s164_s17 = smov 125  }
   0x5   :  { %v20_v7 = vsub.s32 0, %v19_v6  ;;  %v25_v10 = vsub.s32 4, %v19_v6  ;;  %v34_v11 = vsub.s32 1, %v19_v6  ;;  %v44_v13 = vsub.s32 2, %v19_v6 }
   0x6   :  { %148 = vset.pattern.permute.xlu0 %v156_v3  ;;  %150 = vset.pattern.permute.xlu1 %v157_v4  ;;  %v54_v15 = vsub.s32 3, %v19_v6 }
   0x7   :  { %29 = vperm.xlu0 %148, %v11_v1   ;;  %49 = vperm.xlu1 %150, %v11_v1   ;;  %v21_v9 = vrot.slane %v12_v8, %v20_v7  ;;  %v26_v16 = vrot.slane %v12_v8, %v25_v10  ;;  %v35_v18 = vrot.slane %v12_v8, %v34_v11 }
   0x8   :  { %v45_v19 = vrot.slane %v12_v8, %v44_v13  ;;  %v55_v20 = vrot.slane %v12_v8, %v54_v15 }
   0xb   :  { %151 = vset.pattern.permute.xlu1 %v154_v0 }
  0x7d   :  { %v16_v12 = vpop.permute.xlu0 %15  ;;  %v40_v14 = vpop.permute.xlu1 %39 }
  0x7e   :  { %v22_v17 = vmul.f32 %v21_v9, %v16_v12  ;;  %v46_v25 = vmul.f32 %v45_v19, %v40_v14 }
  0x80   :  { %v27_v23 = vadd.f32 %v26_v16, %v22_v17 }
  0x82   :  { %v30_v21 = vpop.permute.xlu0 %29  ;;  %v50_v22 = vpop.permute.xlu1 %49 }
  0x83   :  { %v36_v24 = vmul.f32 %v35_v18, %v30_v21  ;;  %v56_v27 = vmul.f32 %v55_v20, %v50_v22 }
  0x85   :  { %v37_v26 = vadd.f32 %v36_v24, %v27_v23 }
  0x87   :  { %v47_v28 = vadd.f32 %v46_v25, %v37_v26 }
  0x89   :  { %v57_v29 = vadd.f32 %v56_v27, %v47_v28 }
  0x8b   :  { %v58_v30 = vmax.f32 %v57_v29, 0.0 }
  0x8d   :  { %67 = vperm.xlu0 %148, %v58_v30   ;;  %61 = vperm.xlu1 %151, %v58_v30  }
  0x91   :  { %153 = vset.pattern.permute.xlu0 %v157_v4  ;;  %152 = vset.pattern.permute.xlu1 %v155_v2 }
  0x92   :  { %79 = vperm.xlu0 %153, %v58_v30   ;;  %73 = vperm.xlu1 %152, %v58_v30  }
  0x96   :  { %96 = vrot.lane.b32.xlu1 %v35_v18, %s158_s0  ;;  %116 = vrot.lane.b32.xlu0 %v55_v20, %s159_s1 }
  0x9a   :  { %106 = vrot.lane.b32.xlu1 %v45_v19, %s160_s13  ;;  %91 = vrot.lane.b32.xlu0 %v26_v16, %s161_s14 }
  0x9e   :  { %86 = vrot.lane.b32.xlu1 %v21_v9, %s161_s14 }
 0x108   :  { %v68_v31 = vpop.permute.xlu0 %67  ;;  %v62_v32 = vpop.permute.xlu1 %61 }
 0x109   :  { %v64_v33 = vmul.f32 %v62_v32, %v21_v9  ;;  %v70_v34 = vmul.f32 %v68_v31, %v35_v18 }
 0x10b   :  { %v65_v35 = vadd.f32 %v64_v33, %v26_v16 }
 0x10d   :  { %v80_v36 = vpop.permute.xlu0 %79  ;;  %v71_v37 = vadd.f32 %v70_v34, %v65_v35  ;;  %v74_v38 = vpop.permute.xlu1 %73 }
 0x10e   :  { %v76_v39 = vmul.f32 %v74_v38, %v45_v19  ;;  %v82_v40 = vmul.f32 %v80_v36, %v55_v20 }
 0x110   :  { %v77_v41 = vadd.f32 %v76_v39, %v71_v37 }
 0x111   :  { %v97_v42 = vpop.permute.xlu1 %96  ;;  %v117_v48 = vpop.permute.xlu0 %116 }
 0x112   :  { %v83_v43 = vadd.f32 %v82_v40, %v77_v41 }
 0x114   :  { %v84_v44 = vmax.f32 %v83_v43, 0.0 }
 0x115   :  { %v107_v45 = vpop.permute.xlu1 %106  ;;  %v92_v52 = vpop.permute.xlu0 %91 }
 0x116   :  { %v99_v46 = vmul.f32 %v97_v42, %v84_v44  ;;  %v109_v47 = vmul.f32 %v107_v45, %v84_v44  ;;  %v119_v49 = vmul.f32 %v117_v48, %v84_v44 }
 0x118   :  { %101 = vrot.lane.b32.xlu1 %v99_v46, %s162_s15  ;;  %111 = vrot.lane.b32.xlu0 %v109_v47, %s163_s16 }
 0x119   :  { %v87_v50 = vpop.permute.xlu1 %86 }
 0x11a   :  { %v89_v51 = vmul.f32 %v87_v50, %v84_v44 }
 0x11c   :  { %121 = vrot.lane.b32.xlu1 %v119_v49, %s164_s17  ;;  %v94_v53 = vadd.f32 %v92_v52, %v89_v51 }
 0x18a   :  { %v102_v54 = vpop.permute.xlu1 %101  ;;  %v112_v56 = vpop.permute.xlu0 %111 }
 0x18b   :  { %v104_v55 = vadd.f32 %v102_v54, %v94_v53 }
 0x18d   :  { %v114_v57 = vadd.f32 %v112_v56, %v104_v55 }
 0x18e   :  { %v122_v58 = vpop.permute.xlu1 %121 }
 0x18f   :  { %v124_v59 = vadd.f32 %v122_v58, %v114_v57 }
 0x191   :  { %v125_v60 = vmax.f32 %v124_v59, 0.0 }
 0x193   :  { %127 = vrot.lane.b32.xlu0 %v125_v60, %s161_s14 }
 0x205   :  { %v128_v61 = vpop.permute.xlu0 %127 }
 0x206   :  { %131 = vst.msk [vmem:[%s194_s2] sm:$0xff] %vm130_vm0, %v128_v61 }

</bundles_post_ra>
